<compile_context>
chip_gen: v7x
topology: tpu7x:2x2x1
jax: 0.10.0
libtpu: 0.0.40
codegen_flags: <defaults>
</compile_context>

<pallas_src>
import functools

import numpy as np
import jax
import jax.numpy as jnp
from jax.experimental import pallas as pl
from jax.experimental.pallas import tpu as pltpu


# --------------------------------------------------------------------------- #
# Kernel: one batch element = QKV(+rot) projection + RoPE + causal attention
#         over all heads + fused o_proj.
# --------------------------------------------------------------------------- #
def _mha_fused_kernel(x_ref, w_qkv_ref, b_qkv_ref, cos_ref, sin_ref, bias_ref,
                      wo_ref, bo_ref, o_ref, k_ref, v_ref,
                      *, num_heads, head_size):
    H = num_heads * head_size

    x = x_ref[0]                                   # (S, H)
    w_qkv = w_qkv_ref[...]                         # (H, 5H)
    b_qkv = b_qkv_ref[...]                         # (1, 5H)

    # Single wide projection: columns are [q | k | v | q@rot | k@rot], heads
    # concatenated (head h occupies cols h*hs:(h+1)*hs within each H-wide block).
    proj = jnp.dot(x, w_qkv, preferred_element_type=jnp.float32) + b_qkv  # (S, 5H)

    q = proj[:, 0 * H:1 * H]
    k = proj[:, 1 * H:2 * H]
    v = proj[:, 2 * H:3 * H]
    q_rot = proj[:, 3 * H:4 * H]                   # == (x@Wq + bq) @ rot  (per head)
    k_rot = proj[:, 4 * H:5 * H]

    cos = cos_ref[...]                             # (S, H)  per-head cos, tiled
    sin = sin_ref[...]                             # (S, H)

    # RoPE: out[2i] = t[2i]*cos - t[2i+1]*sin ; out[2i+1] = t[2i]*sin + t[2i+1]*cos
    q = q * cos + q_rot * sin
    k = k * cos + k_rot * sin

    bias = bias_ref[...]                           # (S, S) additive causal bias
    scale = 1.0 / (head_size ** 0.5)

    # Static (trace-time) loop over heads; slices are static lane sub-ranges.
    # TODO(synk): for large S, tile the kv axis flash-style with an in-kernel
    # broadcasted_iota causal mask instead of a materialized (S, S) bias.
    head_outs = []
    for h in range(num_heads):
        sl = slice(h * head_size, (h + 1) * head_size)
        qh, kh, vh = q[:, sl], k[:, sl], v[:, sl]
        s = jnp.dot(qh, kh.T, preferred_element_type=jnp.float32) * scale + bias
        s = s - jnp.max(s, axis=-1, keepdims=True)
        p = jnp.exp(s)
        p = p * pl.reciprocal(jnp.sum(p, axis=-1, keepdims=True), approx=True)
        head_outs.append(jnp.dot(p, vh, preferred_element_type=jnp.float32))
    attn = jnp.concatenate(head_outs, axis=-1)     # (S, H)

    # Fused output projection (lane-dense H-wide store).
    o_ref[0] = jnp.dot(attn, wo_ref[...], preferred_element_type=jnp.float32) + bo_ref[...]

    # Post-RoPE k and v, lane-dense (S, H): head h in cols h*hs:(h+1)*hs.
    k_ref[0] = k
    v_ref[0] = v


# --------------------------------------------------------------------------- #
# Wrapper
# --------------------------------------------------------------------------- #
def multi_head_attention(x, attn_bias, params, rope_cos, rope_sin):
    """Returns (out, (k_all, v_all)); k_all/v_all are (B, S, H) with heads
    concatenated along the last dim (head h -> columns h*hs:(h+1)*hs)."""
    B, S, H = x.shape
    nh = params["wq"].shape[0]
    hs = H // nh

    # Pairwise rotation matrix R so that (t @ R)[2i] = -t[2i+1], (t @ R)[2i+1] = t[2i].
    rot = np.zeros((hs, hs), dtype=np.float32)
    for i in range(hs // 2):
        rot[2 * i + 1, 2 * i] = -1.0
        rot[2 * i, 2 * i + 1] = 1.0
    rot = jnp.asarray(rot)

    def stack_w(w):   # (nh, H, hs) -> (H, nh*hs)
        return jnp.transpose(w, (1, 0, 2)).reshape(H, nh * hs)

    def stack_b(b):   # (nh, 1, hs) -> (1, nh*hs)
        return jnp.transpose(b, (1, 0, 2)).reshape(1, nh * hs)

    # Fold the RoPE rotation into extra projection columns (host/XLA-side, one-time).
    wq_rot = params["wq"] @ rot                    # (nh, H, hs)
    wk_rot = params["wk"] @ rot
    bq_rot = params["bq"] @ rot                    # (nh, 1, hs)
    bk_rot = params["bk"] @ rot

    w_qkv = jnp.concatenate(
        [stack_w(params["wq"]), stack_w(params["wk"]), stack_w(params["wv"]),
         stack_w(wq_rot), stack_w(wk_rot)], axis=1)                      # (H, 5H)
    b_qkv = jnp.concatenate(
        [stack_b(params["bq"]), stack_b(params["bk"]), stack_b(params["bv"]),
         stack_b(bq_rot), stack_b(bk_rot)], axis=1)                      # (1, 5H)

    # Per-head cos/sin tiled to the concatenated-heads layout.
    cos_full = jnp.tile(rope_cos[:S], (1, nh))     # (S, H)
    sin_full = jnp.tile(rope_sin[:S], (1, nh))     # (S, H)

    # Advisory cost estimate so XLA can overlap the single custom call.
    flops = B * (2 * S * H * (5 * H)               # fused QKV(+rot) projection
                 + nh * (4 * S * S * hs)           # q@k.T + p@v
                 + 2 * S * H * H)                  # o_proj
    transcendentals = B * nh * S * S               # exp
    bytes_accessed = 4 * (B * S * H                # x
                          + H * 5 * H + 5 * H      # w_qkv, b_qkv
                          + 2 * S * H              # cos/sin
                          + S * S                  # bias
                          + H * H + H              # wo, bo
                          + 3 * B * S * H)         # out, k, v
    cost = pl.CostEstimate(flops=flops, transcendentals=transcendentals,
                           bytes_accessed=bytes_accessed)

    out_sds = jax.ShapeDtypeStruct((B, S, H), jnp.float32)

    kernel = functools.partial(_mha_fused_kernel, num_heads=nh, head_size=hs)

    call = pl.pallas_call(
        kernel,
        out_shape=(out_sds, out_sds, out_sds),
        grid_spec=pltpu.PrefetchScalarGridSpec(
            num_scalar_prefetch=0,
            grid=(B,),
            in_specs=[
                pl.BlockSpec((1, S, H), lambda b: (b, 0, 0)),       # x
                pl.BlockSpec((H, 5 * H), lambda b: (0, 0)),         # stacked QKV(+rot) W
                pl.BlockSpec((1, 5 * H), lambda b: (0, 0)),         # stacked biases
                pl.BlockSpec((S, H), lambda b: (0, 0)),             # cos (tiled)
                pl.BlockSpec((S, H), lambda b: (0, 0)),             # sin (tiled)
                pl.BlockSpec((S, S), lambda b: (0, 0)),             # attn bias
                pl.BlockSpec((H, H), lambda b: (0, 0)),             # Wo (transposed)
                pl.BlockSpec((1, H), lambda b: (0, 0)),             # bo
            ],
            out_specs=[
                pl.BlockSpec((1, S, H), lambda b: (b, 0, 0)),       # out
                pl.BlockSpec((1, S, H), lambda b: (b, 0, 0)),       # k (post-RoPE)
                pl.BlockSpec((1, S, H), lambda b: (b, 0, 0)),       # v
            ],
        ),
        compiler_params=pltpu.CompilerParams(
            dimension_semantics=("parallel",)),                     # B=2 -> both v7x TCs
        cost_estimate=cost,
    )

    out, k_all, v_all = call(x, w_qkv, b_qkv, cos_full, sin_full, attn_bias,
                             params["wo"], params["bo"])
    return out, (k_all, v_all)


# --------------------------------------------------------------------------- #
# Pure-JAX reference (mirrors the PyTorch module, Naive backend, kv_cache=None)
# --------------------------------------------------------------------------- #
def reference(x, attn_bias, params, rope_cos, rope_sin):
    B, S, H = x.shape
    nh = params["wq"].shape[0]
    hs = H // nh
    cos, sin = rope_cos[:S], rope_sin[:S]

    def rope(t):  # t: (B, S, hs), interleaved pairs
        a = t[..., 0::2]
        b = t[..., 1::2]
        ca, sa = cos[:, 0::2], sin[:, 0::2]
        out_a = a * ca - b * sa
        out_b = a * sa + b * ca
        return jnp.stack([out_a, out_b], axis=-1).reshape(B, S, hs)

    head_outs, k_heads, v_heads = [], [], []
    for h in range(nh):
        q = x @ params["wq"][h] + params["bq"][h]
        k = x @ params["wk"][h] + params["bk"][h]
        v = x @ params["wv"][h] + params["bv"][h]
        q, k = rope(q), rope(k)
        scores = jnp.einsum("bqd,bkd->bqk", q, k) / (hs ** 0.5) + attn_bias
        p = jax.nn.softmax(scores, axis=-1)
        head_outs.append(jnp.einsum("bqk,bkd->bqd", p, v))
        k_heads.append(k)
        v_heads.append(v)
    concat = jnp.concatenate(head_outs, axis=2)
    out = concat @ params["wo"] + params["bo"]
    k_all = jnp.concatenate(k_heads, axis=2)
    v_all = jnp.concatenate(v_heads, axis=2)
    return out, k_all, v_all


# --------------------------------------------------------------------------- #
# Main
# --------------------------------------------------------------------------- #
if __name__ == "__main__":
    # Small config consistent with TransformerConfig
    B, S = 2, 8
    H, NH = 32, 4
    HS = H // NH
    MAX_SEQ = 16

    key = jax.random.PRNGKey(0)
    ks = jax.random.split(key, 10)

    # Deterministic synthetic parameters (nn.Linear-like shapes, stored transposed).
    params = {
        "wq": jax.random.normal(ks[0], (NH, H, HS), jnp.float32) * 0.1,
        "wk": jax.random.normal(ks[1], (NH, H, HS), jnp.float32) * 0.1,
        "wv": jax.random.normal(ks[2], (NH, H, HS), jnp.float32) * 0.1,
        "bq": jax.random.normal(ks[3], (NH, 1, HS), jnp.float32) * 0.1,
        "bk": jax.random.normal(ks[4], (NH, 1, HS), jnp.float32) * 0.1,
        "bv": jax.random.normal(ks[5], (NH, 1, HS), jnp.float32) * 0.1,
        "wo": jax.random.normal(ks[6], (H, H), jnp.float32) * 0.1,
        "bo": jax.random.normal(ks[7], (1, H), jnp.float32) * 0.1,
    }

    # RoPE cache (cos/sin of the complex rope_cache, interleaved to full head_size).
    inv_freq = 1.0 / (10000.0 ** (np.arange(0, HS, 2, dtype=np.float32) / HS))  # (HS/2,)
    pos = np.arange(MAX_SEQ, dtype=np.float32)[:, None]                         # (MAX_SEQ, 1)
    ang = pos * inv_freq[None, :]                                               # (MAX_SEQ, HS/2)
    rope_cos = jnp.asarray(np.repeat(np.cos(ang), 2, axis=-1))                  # (MAX_SEQ, HS)
    rope_sin = jnp.asarray(np.repeat(np.sin(ang), 2, axis=-1))                  # (MAX_SEQ, HS)

    # Causal additive attention bias (the `attn_masked_bias` argument).
    causal = np.triu(np.full((S, S), -1e9, dtype=np.float32), k=1)
    attn_bias = jnp.asarray(causal)

    # Input activations.
    x = jax.random.normal(ks[8], (B, S, H), jnp.float32)

    out, (k_all, v_all) = multi_head_attention(x, attn_bias, params, rope_cos, rope_sin)
    out = jax.block_until_ready(out)
    jax.block_until_ready(k_all)
    jax.block_until_ready(v_all)

    ref_out, ref_k, ref_v = reference(x, attn_bias, params, rope_cos, rope_sin)
    assert out.shape == (B, S, H)
    assert k_all.shape == (B, S, H) and v_all.shape == (B, S, H)
    # out tolerance is slightly looser than 2e-4 to accommodate the EUP approx reciprocal.
    np.testing.assert_allclose(np.asarray(out), np.asarray(ref_out), atol=2e-3, rtol=2e-3)
    np.testing.assert_allclose(np.asarray(k_all), np.asarray(ref_k), atol=1e-3, rtol=1e-3)
    np.testing.assert_allclose(np.asarray(v_all), np.asarray(ref_v), atol=1e-3, rtol=1e-3)

    # TODO(synk): kv_cache decode path (positions-indexed RoPE + cache concat) not implemented;
    # this kernel covers the prefill (kv_cache=None) Naive-backend forward.
    print("KERNEL_OK")
</pallas_src>

<mosaic_0001>
module attributes {stable_mosaic.version = 11 : i64} {
  func.func @_mha_fused_kernel(%arg0: i32, %arg1: memref<1x8x32xf32, #tpu.memory_space<vmem>>, %arg2: memref<32x160xf32, #tpu.memory_space<vmem>>, %arg3: memref<1x160xf32, #tpu.memory_space<vmem>>, %arg4: memref<8x32xf32, #tpu.memory_space<vmem>>, %arg5: memref<8x32xf32, #tpu.memory_space<vmem>>, %arg6: memref<8x8xf32, #tpu.memory_space<vmem>>, %arg7: memref<32x32xf32, #tpu.memory_space<vmem>>, %arg8: memref<1x32xf32, #tpu.memory_space<vmem>>, %arg9: memref<1x8x32xf32, #tpu.memory_space<vmem>>, %arg10: memref<1x8x32xf32, #tpu.memory_space<vmem>>, %arg11: memref<1x8x32xf32, #tpu.memory_space<vmem>>) attributes {dimension_semantics = [#tpu.dimension_semantics<parallel>], iteration_bounds = array<i64: 2>, scalar_prefetch = 0 : i64, scratch_operands = 0 : i64, tpu.core_type = #tpu.core_type<tc>, window_params = [{transform_indices = @transform_0, window_bounds = array<i64: 1, 8, 32>}, {pipeline_mode = #tpu.pipeline_mode<synchronous>, transform_indices = @transform_1, window_bounds = array<i64: 32, 160>}, {pipeline_mode = #tpu.pipeline_mode<synchronous>, transform_indices = @transform_2, window_bounds = array<i64: 1, 160>}, {pipeline_mode = #tpu.pipeline_mode<synchronous>, transform_indices = @transform_3, window_bounds = array<i64: 8, 32>}, {pipeline_mode = #tpu.pipeline_mode<synchronous>, transform_indices = @transform_4, window_bounds = array<i64: 8, 32>}, {pipeline_mode = #tpu.pipeline_mode<synchronous>, transform_indices = @transform_5, window_bounds = array<i64: 8, 8>}, {pipeline_mode = #tpu.pipeline_mode<synchronous>, transform_indices = @transform_6, window_bounds = array<i64: 32, 32>}, {pipeline_mode = #tpu.pipeline_mode<synchronous>, transform_indices = @transform_7, window_bounds = array<i64: 1, 32>}, {transform_indices = @transform_8, window_bounds = array<i64: 1, 8, 32>}, {transform_indices = @transform_9, window_bounds = array<i64: 1, 8, 32>}, {transform_indices = @transform_10, window_bounds = array<i64: 1, 8, 32>}]} {
    %c0 = arith.constant 0 : index
    %c0_0 = arith.constant 0 : index
    %c0_1 = arith.constant 0 : index
    %0 = vector.load %arg1[%c0, %c0_0, %c0_1] : memref<1x8x32xf32, #tpu.memory_space<vmem>>, vector<1x8x32xf32>
    %1 = vector.shape_cast %0 : vector<1x8x32xf32> to vector<8x32xf32>
    %c0_2 = arith.constant 0 : index
    %c0_3 = arith.constant 0 : index
    %2 = vector.load %arg2[%c0_2, %c0_3] : memref<32x160xf32, #tpu.memory_space<vmem>>, vector<32x160xf32>
    %c0_4 = arith.constant 0 : index
    %c0_5 = arith.constant 0 : index
    %3 = vector.load %arg3[%c0_4, %c0_5] : memref<1x160xf32, #tpu.memory_space<vmem>>, vector<1x160xf32>
    %cst = arith.constant dense<0.000000e+00> : vector<8x160xf32>
    %4 = tpu.matmul %1, %2, %cst {dimension_numbers = #tpu.dot_dimension_numbers<[1], [0], [0], [1], [0, 0, 1, 1], [], []>} : vector<8x32xf32>, vector<32x160xf32>, vector<8x160xf32> -> vector<8x160xf32>
    %5 = vector.broadcast %3 : vector<1x160xf32> to vector<8x160xf32>
    %6 = arith.addf %4, %5 : vector<8x160xf32>
    %7 = vector.extract_strided_slice %6 {offsets = [0, 0], sizes = [8, 32], strides = [1, 1]} : vector<8x160xf32> to vector<8x32xf32>
    %8 = vector.extract_strided_slice %6 {offsets = [0, 32], sizes = [8, 32], strides = [1, 1]} : vector<8x160xf32> to vector<8x32xf32>
    %9 = vector.extract_strided_slice %6 {offsets = [0, 64], sizes = [8, 32], strides = [1, 1]} : vector<8x160xf32> to vector<8x32xf32>
    %10 = vector.extract_strided_slice %6 {offsets = [0, 96], sizes = [8, 32], strides = [1, 1]} : vector<8x160xf32> to vector<8x32xf32>
    %11 = vector.extract_strided_slice %6 {offsets = [0, 128], sizes = [8, 32], strides = [1, 1]} : vector<8x160xf32> to vector<8x32xf32>
    %c0_6 = arith.constant 0 : index
    %c0_7 = arith.constant 0 : index
    %12 = vector.load %arg4[%c0_6, %c0_7] : memref<8x32xf32, #tpu.memory_space<vmem>>, vector<8x32xf32>
    %c0_8 = arith.constant 0 : index
    %c0_9 = arith.constant 0 : index
    %13 = vector.load %arg5[%c0_8, %c0_9] : memref<8x32xf32, #tpu.memory_space<vmem>>, vector<8x32xf32>
    %14 = arith.mulf %7, %12 : vector<8x32xf32>
    %15 = arith.mulf %10, %13 : vector<8x32xf32>
    %16 = arith.addf %14, %15 : vector<8x32xf32>
    %17 = arith.mulf %8, %12 : vector<8x32xf32>
    %18 = arith.mulf %11, %13 : vector<8x32xf32>
    %19 = arith.addf %17, %18 : vector<8x32xf32>
    %c0_10 = arith.constant 0 : index
    %c0_11 = arith.constant 0 : index
    %20 = vector.load %arg6[%c0_10, %c0_11] : memref<8x8xf32, #tpu.memory_space<vmem>>, vector<8x8xf32>
    %21 = vector.extract_strided_slice %16 {offsets = [0, 0], sizes = [8, 8], strides = [1, 1]} : vector<8x32xf32> to vector<8x8xf32>
    %22 = vector.extract_strided_slice %19 {offsets = [0, 0], sizes = [8, 8], strides = [1, 1]} : vector<8x32xf32> to vector<8x8xf32>
    %23 = vector.extract_strided_slice %9 {offsets = [0, 0], sizes = [8, 8], strides = [1, 1]} : vector<8x32xf32> to vector<8x8xf32>
    %24 = tpu.transpose %22, [1, 0] : vector<8x8xf32> -> vector<8x8xf32>
    %cst_12 = arith.constant dense<0.000000e+00> : vector<8x8xf32>
    %25 = tpu.matmul %21, %24, %cst_12 {dimension_numbers = #tpu.dot_dimension_numbers<[1], [0], [0], [1], [0, 0, 1, 1], [], []>} : vector<8x8xf32>, vector<8x8xf32>, vector<8x8xf32> -> vector<8x8xf32>
    %cst_13 = arith.constant 0.353553385 : f32
    %26 = vector.broadcast %cst_13 : f32 to vector<8x8xf32>
    %27 = arith.mulf %25, %26 : vector<8x8xf32>
    %28 = arith.addf %27, %20 : vector<8x8xf32>
    %cst_14 = arith.constant dense<0xFF800000> : vector<8xf32>
    %29 = vector.multi_reduction <maximumf>, %28, %cst_14 [1] : vector<8x8xf32> to vector<8xf32>
    %30 = vector.shape_cast %29 : vector<8xf32> to vector<8x1xf32>
    %31 = vector.broadcast %30 : vector<8x1xf32> to vector<8x8xf32>
    %32 = arith.subf %28, %31 : vector<8x8xf32>
    %33 = math.exp %32 : vector<8x8xf32>
    %cst_15 = arith.constant dense<0.000000e+00> : vector<8xf32>
    %34 = vector.multi_reduction <add>, %33, %cst_15 [1] : vector<8x8xf32> to vector<8xf32>
    %35 = vector.shape_cast %34 : vector<8xf32> to vector<8x1xf32>
    %36 = tpu.reciprocal %35 {approx = true} : vector<8x1xf32> -> vector<8x1xf32>
    %37 = vector.broadcast %36 : vector<8x1xf32> to vector<8x8xf32>
    %38 = arith.mulf %33, %37 : vector<8x8xf32>
    %cst_16 = arith.constant dense<0.000000e+00> : vector<8x8xf32>
    %39 = tpu.matmul %38, %23, %cst_16 {dimension_numbers = #tpu.dot_dimension_numbers<[1], [0], [0], [1], [0, 0, 1, 1], [], []>} : vector<8x8xf32>, vector<8x8xf32>, vector<8x8xf32> -> vector<8x8xf32>
    %40 = vector.extract_strided_slice %16 {offsets = [0, 8], sizes = [8, 8], strides = [1, 1]} : vector<8x32xf32> to vector<8x8xf32>
    %41 = vector.extract_strided_slice %19 {offsets = [0, 8], sizes = [8, 8], strides = [1, 1]} : vector<8x32xf32> to vector<8x8xf32>
    %42 = vector.extract_strided_slice %9 {offsets = [0, 8], sizes = [8, 8], strides = [1, 1]} : vector<8x32xf32> to vector<8x8xf32>
    %43 = tpu.transpose %41, [1, 0] : vector<8x8xf32> -> vector<8x8xf32>
    %cst_17 = arith.constant dense<0.000000e+00> : vector<8x8xf32>
    %44 = tpu.matmul %40, %43, %cst_17 {dimension_numbers = #tpu.dot_dimension_numbers<[1], [0], [0], [1], [0, 0, 1, 1], [], []>} : vector<8x8xf32>, vector<8x8xf32>, vector<8x8xf32> -> vector<8x8xf32>
    %cst_18 = arith.constant 0.353553385 : f32
    %45 = vector.broadcast %cst_18 : f32 to vector<8x8xf32>
    %46 = arith.mulf %44, %45 : vector<8x8xf32>
    %47 = arith.addf %46, %20 : vector<8x8xf32>
    %cst_19 = arith.constant dense<0xFF800000> : vector<8xf32>
    %48 = vector.multi_reduction <maximumf>, %47, %cst_19 [1] : vector<8x8xf32> to vector<8xf32>
    %49 = vector.shape_cast %48 : vector<8xf32> to vector<8x1xf32>
    %50 = vector.broadcast %49 : vector<8x1xf32> to vector<8x8xf32>
    %51 = arith.subf %47, %50 : vector<8x8xf32>
    %52 = math.exp %51 : vector<8x8xf32>
    %cst_20 = arith.constant dense<0.000000e+00> : vector<8xf32>
    %53 = vector.multi_reduction <add>, %52, %cst_20 [1] : vector<8x8xf32> to vector<8xf32>
    %54 = vector.shape_cast %53 : vector<8xf32> to vector<8x1xf32>
    %55 = tpu.reciprocal %54 {approx = true} : vector<8x1xf32> -> vector<8x1xf32>
    %56 = vector.broadcast %55 : vector<8x1xf32> to vector<8x8xf32>
    %57 = arith.mulf %52, %56 : vector<8x8xf32>
    %cst_21 = arith.constant dense<0.000000e+00> : vector<8x8xf32>
    %58 = tpu.matmul %57, %42, %cst_21 {dimension_numbers = #tpu.dot_dimension_numbers<[1], [0], [0], [1], [0, 0, 1, 1], [], []>} : vector<8x8xf32>, vector<8x8xf32>, vector<8x8xf32> -> vector<8x8xf32>
    %59 = vector.extract_strided_slice %16 {offsets = [0, 16], sizes = [8, 8], strides = [1, 1]} : vector<8x32xf32> to vector<8x8xf32>
    %60 = vector.extract_strided_slice %19 {offsets = [0, 16], sizes = [8, 8], strides = [1, 1]} : vector<8x32xf32> to vector<8x8xf32>
    %61 = vector.extract_strided_slice %9 {offsets = [0, 16], sizes = [8, 8], strides = [1, 1]} : vector<8x32xf32> to vector<8x8xf32>
    %62 = tpu.transpose %60, [1, 0] : vector<8x8xf32> -> vector<8x8xf32>
    %cst_22 = arith.constant dense<0.000000e+00> : vector<8x8xf32>
    %63 = tpu.matmul %59, %62, %cst_22 {dimension_numbers = #tpu.dot_dimension_numbers<[1], [0], [0], [1], [0, 0, 1, 1], [], []>} : vector<8x8xf32>, vector<8x8xf32>, vector<8x8xf32> -> vector<8x8xf32>
    %cst_23 = arith.constant 0.353553385 : f32
    %64 = vector.broadcast %cst_23 : f32 to vector<8x8xf32>
    %65 = arith.mulf %63, %64 : vector<8x8xf32>
    %66 = arith.addf %65, %20 : vector<8x8xf32>
    %cst_24 = arith.constant dense<0xFF800000> : vector<8xf32>
    %67 = vector.multi_reduction <maximumf>, %66, %cst_24 [1] : vector<8x8xf32> to vector<8xf32>
    %68 = vector.shape_cast %67 : vector<8xf32> to vector<8x1xf32>
    %69 = vector.broadcast %68 : vector<8x1xf32> to vector<8x8xf32>
    %70 = arith.subf %66, %69 : vector<8x8xf32>
    %71 = math.exp %70 : vector<8x8xf32>
    %cst_25 = arith.constant dense<0.000000e+00> : vector<8xf32>
    %72 = vector.multi_reduction <add>, %71, %cst_25 [1] : vector<8x8xf32> to vector<8xf32>
    %73 = vector.shape_cast %72 : vector<8xf32> to vector<8x1xf32>
    %74 = tpu.reciprocal %73 {approx = true} : vector<8x1xf32> -> vector<8x1xf32>
    %75 = vector.broadcast %74 : vector<8x1xf32> to vector<8x8xf32>
    %76 = arith.mulf %71, %75 : vector<8x8xf32>
    %cst_26 = arith.constant dense<0.000000e+00> : vector<8x8xf32>
    %77 = tpu.matmul %76, %61, %cst_26 {dimension_numbers = #tpu.dot_dimension_numbers<[1], [0], [0], [1], [0, 0, 1, 1], [], []>} : vector<8x8xf32>, vector<8x8xf32>, vector<8x8xf32> -> vector<8x8xf32>
    %78 = vector.extract_strided_slice %16 {offsets = [0, 24], sizes = [8, 8], strides = [1, 1]} : vector<8x32xf32> to vector<8x8xf32>
    %79 = vector.extract_strided_slice %19 {offsets = [0, 24], sizes = [8, 8], strides = [1, 1]} : vector<8x32xf32> to vector<8x8xf32>
    %80 = vector.extract_strided_slice %9 {offsets = [0, 24], sizes = [8, 8], strides = [1, 1]} : vector<8x32xf32> to vector<8x8xf32>
    %81 = tpu.transpose %79, [1, 0] : vector<8x8xf32> -> vector<8x8xf32>
    %cst_27 = arith.constant dense<0.000000e+00> : vector<8x8xf32>
    %82 = tpu.matmul %78, %81, %cst_27 {dimension_numbers = #tpu.dot_dimension_numbers<[1], [0], [0], [1], [0, 0, 1, 1], [], []>} : vector<8x8xf32>, vector<8x8xf32>, vector<8x8xf32> -> vector<8x8xf32>
    %cst_28 = arith.constant 0.353553385 : f32
    %83 = vector.broadcast %cst_28 : f32 to vector<8x8xf32>
    %84 = arith.mulf %82, %83 : vector<8x8xf32>
    %85 = arith.addf %84, %20 : vector<8x8xf32>
    %cst_29 = arith.constant dense<0xFF800000> : vector<8xf32>
    %86 = vector.multi_reduction <maximumf>, %85, %cst_29 [1] : vector<8x8xf32> to vector<8xf32>
    %87 = vector.shape_cast %86 : vector<8xf32> to vector<8x1xf32>
    %88 = vector.broadcast %87 : vector<8x1xf32> to vector<8x8xf32>
    %89 = arith.subf %85, %88 : vector<8x8xf32>
    %90 = math.exp %89 : vector<8x8xf32>
    %cst_30 = arith.constant dense<0.000000e+00> : vector<8xf32>
    %91 = vector.multi_reduction <add>, %90, %cst_30 [1] : vector<8x8xf32> to vector<8xf32>
    %92 = vector.shape_cast %91 : vector<8xf32> to vector<8x1xf32>
    %93 = tpu.reciprocal %92 {approx = true} : vector<8x1xf32> -> vector<8x1xf32>
    %94 = vector.broadcast %93 : vector<8x1xf32> to vector<8x8xf32>
    %95 = arith.mulf %90, %94 : vector<8x8xf32>
    %cst_31 = arith.constant dense<0.000000e+00> : vector<8x8xf32>
    %96 = tpu.matmul %95, %80, %cst_31 {dimension_numbers = #tpu.dot_dimension_numbers<[1], [0], [0], [1], [0, 0, 1, 1], [], []>} : vector<8x8xf32>, vector<8x8xf32>, vector<8x8xf32> -> vector<8x8xf32>
    %97 = tpu.concatenate %39, %58, %77, %96 in 1 : vector<8x8xf32>, vector<8x8xf32>, vector<8x8xf32>, vector<8x8xf32> -> vector<8x32xf32>
    %c0_32 = arith.constant 0 : index
    %c0_33 = arith.constant 0 : index
    %98 = vector.load %arg7[%c0_32, %c0_33] : memref<32x32xf32, #tpu.memory_space<vmem>>, vector<32x32xf32>
    %cst_34 = arith.constant dense<0.000000e+00> : vector<8x32xf32>
    %99 = tpu.matmul %97, %98, %cst_34 {dimension_numbers = #tpu.dot_dimension_numbers<[1], [0], [0], [1], [0, 0, 1, 1], [], []>} : vector<8x32xf32>, vector<32x32xf32>, vector<8x32xf32> -> vector<8x32xf32>
    %c0_35 = arith.constant 0 : index
    %c0_36 = arith.constant 0 : index
    %100 = vector.load %arg8[%c0_35, %c0_36] : memref<1x32xf32, #tpu.memory_space<vmem>>, vector<1x32xf32>
    %101 = vector.broadcast %100 : vector<1x32xf32> to vector<8x32xf32>
    %102 = arith.addf %99, %101 : vector<8x32xf32>
    %c0_37 = arith.constant 0 : index
    %c0_38 = arith.constant 0 : index
    %c0_39 = arith.constant 0 : index
    %103 = vector.load %arg9[%c0_37, %c0_38, %c0_39] : memref<1x8x32xf32, #tpu.memory_space<vmem>>, vector<1x8x32xf32>
    %104 = vector.shape_cast %103 : vector<1x8x32xf32> to vector<8x32xf32>
    %105 = vector.shape_cast %102 : vector<8x32xf32> to vector<1x8x32xf32>
    tpu.vector_store %arg9[%c0_37, %c0_38, %c0_39], %105 {strides = array<i32>} : memref<1x8x32xf32, #tpu.memory_space<vmem>>, vector<1x8x32xf32>,
    %c0_40 = arith.constant 0 : index
    %c0_41 = arith.constant 0 : index
    %c0_42 = arith.constant 0 : index
    %106 = vector.load %arg10[%c0_40, %c0_41, %c0_42] : memref<1x8x32xf32, #tpu.memory_space<vmem>>, vector<1x8x32xf32>
    %107 = vector.shape_cast %106 : vector<1x8x32xf32> to vector<8x32xf32>
    %108 = vector.shape_cast %19 : vector<8x32xf32> to vector<1x8x32xf32>
    tpu.vector_store %arg10[%c0_40, %c0_41, %c0_42], %108 {strides = array<i32>} : memref<1x8x32xf32, #tpu.memory_space<vmem>>, vector<1x8x32xf32>,
    %c0_43 = arith.constant 0 : index
    %c0_44 = arith.constant 0 : index
    %c0_45 = arith.constant 0 : index
    %109 = vector.load %arg11[%c0_43, %c0_44, %c0_45] : memref<1x8x32xf32, #tpu.memory_space<vmem>>, vector<1x8x32xf32>
    %110 = vector.shape_cast %109 : vector<1x8x32xf32> to vector<8x32xf32>
    %111 = vector.shape_cast %9 : vector<8x32xf32> to vector<1x8x32xf32>
    tpu.vector_store %arg11[%c0_43, %c0_44, %c0_45], %111 {strides = array<i32>} : memref<1x8x32xf32, #tpu.memory_space<vmem>>, vector<1x8x32xf32>,
    return
  }
  func.func @transform_0(%arg0: i32) -> (i32, i32, i32) {
    %c0_i32 = arith.constant 0 : i32
    %c0_i32_0 = arith.constant 0 : i32
    %c0_i32_1 = arith.constant 0 : i32
    return %arg0, %c0_i32, %c0_i32_0 : i32, i32, i32
  }
  func.func @transform_1(%arg0: i32) -> (i32, i32) {
    %c0_i32 = arith.constant 0 : i32
    %c0_i32_0 = arith.constant 0 : i32
    %c0_i32_1 = arith.constant 0 : i32
    return %c0_i32, %c0_i32_0 : i32, i32
  }
  func.func @transform_2(%arg0: i32) -> (i32, i32) {
    %c0_i32 = arith.constant 0 : i32
    %c0_i32_0 = arith.constant 0 : i32
    %c0_i32_1 = arith.constant 0 : i32
    return %c0_i32, %c0_i32_0 : i32, i32
  }
  func.func @transform_3(%arg0: i32) -> (i32, i32) {
    %c0_i32 = arith.constant 0 : i32
    %c0_i32_0 = arith.constant 0 : i32
    %c0_i32_1 = arith.constant 0 : i32
    return %c0_i32, %c0_i32_0 : i32, i32
  }
  func.func @transform_4(%arg0: i32) -> (i32, i32) {
    %c0_i32 = arith.constant 0 : i32
    %c0_i32_0 = arith.constant 0 : i32
    %c0_i32_1 = arith.constant 0 : i32
    return %c0_i32, %c0_i32_0 : i32, i32
  }
  func.func @transform_5(%arg0: i32) -> (i32, i32) {
    %c0_i32 = arith.constant 0 : i32
    %c0_i32_0 = arith.constant 0 : i32
    %c0_i32_1 = arith.constant 0 : i32
    return %c0_i32, %c0_i32_0 : i32, i32
  }
  func.func @transform_6(%arg0: i32) -> (i32, i32) {
    %c0_i32 = arith.constant 0 : i32
    %c0_i32_0 = arith.constant 0 : i32
    %c0_i32_1 = arith.constant 0 : i32
    return %c0_i32, %c0_i32_0 : i32, i32
  }
  func.func @transform_7(%arg0: i32) -> (i32, i32) {
    %c0_i32 = arith.constant 0 : i32
    %c0_i32_0 = arith.constant 0 : i32
    %c0_i32_1 = arith.constant 0 : i32
    return %c0_i32, %c0_i32_0 : i32, i32
  }
  func.func @transform_8(%arg0: i32) -> (i32, i32, i32) {
    %c0_i32 = arith.constant 0 : i32
    %c0_i32_0 = arith.constant 0 : i32
    %c0_i32_1 = arith.constant 0 : i32
    return %arg0, %c0_i32, %c0_i32_0 : i32, i32, i32
  }
  func.func @transform_9(%arg0: i32) -> (i32, i32, i32) {
    %c0_i32 = arith.constant 0 : i32
    %c0_i32_0 = arith.constant 0 : i32
    %c0_i32_1 = arith.constant 0 : i32
    return %arg0, %c0_i32, %c0_i32_0 : i32, i32, i32
  }
  func.func @transform_10(%arg0: i32) -> (i32, i32, i32) {
    %c0_i32 = arith.constant 0 : i32
    %c0_i32_0 = arith.constant 0 : i32
    %c0_i32_1 = arith.constant 0 : i32
    return %arg0, %c0_i32, %c0_i32_0 : i32, i32, i32
  }
}

</mosaic_0001>

<bundles_post_ra>
// kernel: tpu_custom_call.1
= control target key start
LH: loop header
LB: loop body
LE: loop exit
PB: predicated region body
PF: predicated region fallthrough
CT: control target
= control target key end

     0   :  { %s2534_s0 = inlined_call_operand.hbm [shape: f32[2,8,32], index: 0, kind: input, shape index: {}]   ;;  %s2535_s1 = inlined_call_operand.hbm [shape: f32[32,160], index: 1, kind: input, shape index: {}]   ;;  %s2536_s2 = inlined_call_operand.vmem [shape: f32[1,160], index: 2, kind: input, shape index: {}]   ;;  %s2537_s3 = inlined_call_operand.vmem [shape: f32[8,32], index: 3, kind: input, shape index: {}]   ;;  %s2538_s4 = inlined_call_operand.hbm [shape: f32[8,32], index: 4, kind: input, shape index: {}]   ;;  %s2539_s5 = inlined_call_operand.vmem [shape: f32[8,8], index: 5, kind: input, shape index: {}]   ;;  %s2540_s6 = inlined_call_operand.hbm [shape: f32[32,32], index: 6, kind: input, shape index: {}]   ;;  %s2541_s7 = inlined_call_operand.vmem [shape: f32[1,32], index: 7, kind: input, shape index: {}]   ;;  %s2542_s8 = inlined_call_operand.hbm [shape: f32[2,8,32], index: 8, kind: output, shape index: {0}]   ;;  %s2543_s9 = inlined_call_operand.hbm [shape: f32[2,8,32], index: 9, kind: output, shape index: {1}]   ;;  %s2544_s10 = inlined_call_operand.hbm [shape: f32[2,8,32], index: 10, kind: output, shape index: {2}]  }
   0x1   :  { %2552 = sst [smem:[#allocation21_spill]] %s2541_s7 }
   0x2   :  { %2553 = sst [smem:[#allocation22_spill]] %s2542_s8 }
   0x3   :  { %16 = vsyncpa [#allocation3], 0 }
   0x4   :  { %18 = vsyncpa [#allocation3 + $0x1], 0 }
   0x5   :  { %19 = vsyncpa [#allocation6], 0 }
   0x6   :  { %20 = vsyncpa [#allocation9], 0 }
   0x7   :  { %21 = vsyncpa [#allocation4], 0 }
   0x8   :  { %23 = vsyncpa [#allocation4 + $0x1], 0 }
   0x9   :  { %24 = vsyncpa [#allocation12], 0 }
   0xa   :  { %26 = vsyncpa [#allocation12 + $0x1], 0  ;;  %s2125_s13 = smov 0   ;;  %s2127_s14 = smov 0  }
   0xb   :  { %s2129_s15 = smov 0   ;;  %s2131_s16 = smov 0  }
   0xc LB: > { %2554 = sst [smem:[#allocation19_spill]] %s2027_s13  ;;  %s2146_s17 = sadd.s32 4294967295, %s2039_s16   ;;  %s2039_s16 = sphi %s2131_s16, %s2580_s16   ;;  %s2035_s15 = sphi %s2129_s15, %s2579_s15   ;;  %s2031_s14 = sphi %s2127_s14, %s2578_s14   ;;  %s2027_s13 = sphi %s2125_s13, %s2577_s13  }
   0xd   : > { %s2545_s18 = sadd.s32 4294967294, %s2039_s16   ;;  %p52_p0 = scmp.ne.s32.totalorder %s2031_s14, %s2027_s13 }
   0xe   : > { %p2546_p1 = scmp.eq.s32.totalorder %s2146_s17, 0  ;;  %p229_p3 = scmp.eq.s32.totalorder %s2545_s18, 1 }
   0xf   : > { %p1542_p5 = scmp.ge.s32.totalorder %s2039_s16, 1  ;;  %p288_p7 = scmp.lt.s32.totalorder %s2039_s16, 3 }
  0x10   : > { %p2157_p4 = por %p2546_p1, %p52_p0  ;;  %p2162_p6 = por %p229_p3, %p52_p0 }
  0x11   : > { %p2167_p8 = pnand %p1542_p5, %p288_p7  ;;  %s2041_s22 = smov [#allocation5]  }
  0x12   : > { %s2555_s19 = scalar_select %p2157_p4, 1, 0 }
  0x13   : > { %s2556_s20 = scalar_select %p2162_p6, 1, 0 }
  0x14   : > { %s2558_s21 = scalar_select %p2167_p8, 1, 0 }
  0x15   : > { %2557 = sst [smem:[#allocation20_spill]] %s2556_s20  ;;  %s300_s23 = sshll.u32 %s2041_s22, 4  ;;  %s2171_s23 = int_to_ptr.vmem [resolvable:$true] %s300_s23 }
  0x16   : > { %p1686_p9 = pneg %p2167_p8  ;;  %s2042_s25 = smov [#allocation7]  }
  0x17   : > { %s320_s26 = sshll.u32 %s2042_s25, 4  ;;  %s2043_s27 = smov [#allocation8]   ;;  %s2182_s26 = int_to_ptr.vmem [resolvable:$true] %s320_s26 }
  0x18   : > { %p2178_p11 = pnand %p1686_p9, %p2546_p1  ;;  %s2184_s28 = sshll.u32 %s2043_s27, 4  ;;  %s334_s28 = int_to_ptr.vmem [resolvable:$true] %s2184_s28 }
  0x19   : > { %s1791_s11 = scalar_lea.hbm %s2535_s1, 1024 }
  0x1a   : > { %p1792_p12 = scmp.ne.s32.totalorder %s2535_s1, %s1791_s11  ;;  %p2194_p13 = pneg %p2178_p11 }
  0x1b   : > { %p1798_p5 = scmp.lt.u32.totalorder %s1791_s11, %s2535_s1 }
  0x1c   : > { %p1794_p0 = pnand %p2194_p13, %p1792_p12 }
  0x1e   : > { %p1795_p3 = pneg %p1794_p0 }
  0x20   : > { %p1800_p7 = pnand %p1798_p5, %p1795_p3 }
  0x22   : > { %1803 = shalt.err (!%p1800_p7)
}
  0x23   : > { %s1804_s29 = scalar_lea.vmem %s2171_s23, 1024  ;;  %p1812_p2 = scmp.lt.s32.totalorder %s2171_s23, %s2171_s23 }
  0x24   : > { %p1805_p9 = scmp.ne.s32.totalorder %s2171_s23, %s1804_s29  ;;  %p1813_p6 = scmp.lt.s32.totalorder %s1804_s29, %s1804_s29 }
  0x26   : > { %p1807_p10 = pnand %p1805_p9, %p2194_p13  ;;  %p1814_p12 = por %p1813_p6, %p1812_p2 }
  0x28   : > { %p1808_p1 = pneg %p1807_p10 }
  0x2a   : > { %p1815_p0 = pnand %p1814_p12, %p1808_p1 }
  0x2c   : > { %1818 = shalt.err (!%p1815_p0)
}
  0x2d   : > { %s2044_s30 = smov 256   ;;  %s2045_s11 = smov 16  }
  0x2e   : > { %1689 = dma.hbm_to_vmem [thread:$0]  (!%p2178_p11), %s2535_s1, 1024, %s2171_s23, [#allocation6], %s2044_s30, %s2044_s30, %s2045_s11  }
  0x2f   : > { %s1819_s20 = scalar_lea.hbm %s2538_s4, 128 }
  0x30   : > { %p1820_p2 = scmp.ne.s32.totalorder %s2538_s4, %s1819_s20  ;;  %p1826_p10 = scmp.lt.u32.totalorder %s1819_s20, %s2538_s4 }
  0x32   : > { %p1822_p1 = pnand %p1820_p2, %p2194_p13 }
  0x34   : > { %p1823_p6 = pneg %p1822_p1 }
  0x36   : > { %p1828_p3 = pnand %p1826_p10, %p1823_p6 }
  0x38   : > { %1831 = shalt.err (!%p1828_p3)
}
  0x39   : > { %s1832_s23 = scalar_lea.vmem %s2182_s26, 128  ;;  %p1840_p12 = scmp.lt.s32.totalorder %s2182_s26, %s2182_s26 }
  0x3a   : > { %p1833_p5 = scmp.ne.s32.totalorder %s2182_s26, %s1832_s23  ;;  %p1841_p0 = scmp.lt.s32.totalorder %s1832_s23, %s1832_s23 }
  0x3c   : > { %p1835_p7 = pnand %p1833_p5, %p2194_p13  ;;  %p1842_p2 = por %p1841_p0, %p1840_p12 }
  0x3e   : > { %p1836_p9 = pneg %p1835_p7 }
  0x40   : > { %p1843_p1 = pnand %p1842_p2, %p1836_p9 }
  0x42   : > { %1846 = shalt.err (!%p1843_p1)
}
  0x43   : > { %1692 = dma.hbm_to_vmem [thread:$0]  (!%p2178_p11), %s2538_s4, 128, %s2182_s26, [#allocation6]  }
  0x44   : > { %s1847_s30 = scalar_lea.hbm %s2540_s6, 512 }
  0x45   : > { %p1848_p6 = scmp.ne.s32.totalorder %s2540_s6, %s1847_s30  ;;  %p1854_p5 = scmp.lt.u32.totalorder %s1847_s30, %s2540_s6 }
  0x47   : > { %p1850_p10 = pnand %p1848_p6, %p2194_p13 }
  0x49   : > { %p1851_p3 = pneg %p1850_p10 }
  0x4b   : > { %p1856_p7 = pnand %p1854_p5, %p1851_p3 }
  0x4d   : > { %1859 = shalt.err (!%p1856_p7)
}
  0x4e   : > { %s1860_s27 = scalar_lea.vmem %s334_s28, 512  ;;  %p1868_p2 = scmp.lt.s32.totalorder %s334_s28, %s334_s28 }
  0x4f   : > { %p1861_p9 = scmp.ne.s32.totalorder %s334_s28, %s1860_s27  ;;  %p1869_p1 = scmp.lt.s32.totalorder %s1860_s27, %s1860_s27 }
  0x51   : > { %p1863_p12 = pnand %p1861_p9, %p2194_p13  ;;  %p1870_p4 = por %p1869_p1, %p1868_p2 }
  0x53   : > { %p1864_p0 = pneg %p1863_p12 }
  0x55   : > { %p1871_p8 = pnand %p1870_p4, %p1864_p0 }
  0x57   : > { %1874 = shalt.err (!%p1871_p8)
}
  0x58   : > { %s2046_s26 = smov 128   ;;  %s2047_s18 = smov 8  }
  0x59   : > { %1695 = dma.hbm_to_vmem [thread:$0]  (!%p2178_p11), %s2540_s6, 512, %s334_s28, [#allocation9], %s2046_s26, %s2046_s26, %s2047_s18  }
  0x5a   : > { %s2258_s7 = sadd.s32 1, %s2039_s16   ;;  %s39_s13 = sadd.s32 1, %s2035_s15 }
  0x5b   : > { %s36_s8 = ssub.s32 %s2039_s16, %s2258_s7  ;;  %p46_p8 = scmp.ne.s32.totalorder %s2035_s15, %s2031_s14 }
  0x5c   : > { %p37_p4 = scmp.eq.s32.totalorder %s36_s8, 0  ;;  %p47_p13 = scmp.eq.s32.totalorder %s2039_s16, 0 }
  0x5d   : > { %p1713_p6 = scmp.lt.s32.totalorder %s2039_s16, 2  ;;  %p2561_p3 = scmp.eq.s32.totalorder %s2146_s17, 1 }
  0x5e   : > { %s2268_s20 = scalar_select %p37_p4, %s2035_s15, %s39_s13  }
  0x5f   : > { %p48_p10 = por %p47_p13, %p46_p8  ;;  %p2272_p5 = por %p2561_p3, %p46_p8 }
  0x60   : > { %s350_s24 = sand.u32 1, %s2035_s15   ;;  %s1548_s11 = sshll.u32 %s2039_s16, 7 }
  0x61   : > { %s1547_s28 = sshll.u32 %s350_s24, 3  ;;  %s2281_s25 = scalar_lea.hbm %s2534_s0, %s1548_s11 }
  0x62   : > { %s354_s27 = scalar_lea.vmem [#allocation2], %s1547_s28  ;;  %p2283_p11 = pnand %p1713_p6, %p48_p10 }
  0x63   : > { %s361_s26 = sshll.u32 %s354_s27, 4  ;;  %s351_s29 = scalar_lea.sflag [#allocation3], %s350_s24  ;;  %s2287_s26 = int_to_ptr.vmem [resolvable:$true] %s361_s26 }
  0x64   : > { %s1875_s23 = scalar_lea.hbm %s2281_s25, 128  ;;  %p1877_p9 = pneg %p2283_p11 }
  0x65   : > { %p1876_p7 = scmp.ne.s32.totalorder %s2281_s25, %s1875_s23  ;;  %s1880_s11 = scalar_lea.hbm %s2534_s0, 256 }
  0x66   : > { %p1881_p2 = scmp.lt.u32.totalorder %s2281_s25, %s2534_s0  ;;  %p1882_p1 = scmp.lt.u32.totalorder %s1880_s11, %s1875_s23 }
  0x67   : > { %p1878_p12 = pnand %p1877_p9, %p1876_p7  ;;  %p1884_p8 = scmp.lt.u32.totalorder %s1875_s23, %s2281_s25 }
  0x68   : > { %p1883_p4 = por %p1882_p1, %p1881_p2 }
  0x69   : > { %p1879_p0 = pneg %p1878_p12 }
  0x6a   : > { %p1885_p13 = por %p1884_p8, %p1883_p4 }
  0x6c   : > { %p1886_p6 = pnand %p1885_p13, %p1879_p0 }
  0x6e   : > { %1889 = shalt.err (!%p1886_p6)
}
  0x6f   : > { %s1890_s24 = scalar_lea.vmem %s2287_s26, 128  ;;  %s2048_s22 = smov [#allocation2]  }
  0x70   : > { %p1891_p10 = scmp.ne.s32.totalorder %s2287_s26, %s1890_s24  ;;  %s1895_s27 = sshll.u32 %s2048_s22, 4  ;;  %s1896_s27 = int_to_ptr.vmem [resolvable:$false] %s1895_s27 }
  0x71   : > { %s1897_s8 = scalar_lea.vmem %s1896_s27, 256  ;;  %p1898_p12 = scmp.lt.s32.totalorder %s2287_s26, %s1896_s27 }
  0x72   : > { %p1893_p3 = pnand %p1891_p10, %p1877_p9  ;;  %p1899_p2 = scmp.lt.s32.totalorder %s1897_s8, %s1890_s24 }
  0x74   : > { %p1894_p7 = pneg %p1893_p3  ;;  %p1900_p1 = por %p1899_p2, %p1898_p12 }
  0x76   : > { %p1901_p4 = pnand %p1900_p1, %p1894_p7 }
  0x78   : > { %1904 = shalt.err (!%p1901_p4)
}
  0x79   : > { %1699 = dma.hbm_to_vmem [thread:$0]  (!%p2283_p11), %s2281_s25, 128, %s2287_s26, %s351_s29  }
  0x7a   : > { %p2564_p0 = scmp.ne.s32.totalorder %s2558_s21, 0 }
  0x7b   : > { %s2317_s23 = sand.u32 (!%p2564_p0), 1, %s2031_s14   ;;  %p2565_p9 = scmp.ne.s32.totalorder (!%p2564_p0), %s2555_s19, 0 }
  0x7c   : > { %370 = sbr.rel (%p2564_p0) target bundleno = 2238 (0x8be), region = 52  ;;  %s2320_s13 = sshll.u32 (!%p2564_p0), %s2317_s23, 3 }
  0x7d   : > { %s373_s11 = scalar_lea.sflag (!%p2564_p0), [#allocation3], %s2317_s23  ;;  %s376_s28 = scalar_lea.vmem (!%p2564_p0), [#allocation2], %s2320_s13 }
  0x83   : > { %2006 = dma.done.wait (%p2565_p9), %s373_s11, 128  }
  0x84   : > { %2008 = vsyncadd (%p2565_p9), %s373_s11, 4294967168  ;;  %p2566_p11 = scmp.eq.s32.totalorder %s2146_s17, 0 }
  0x86   : > { %2010 = dma.done.wait (%p2566_p11), [#allocation6], 1152   ;;  %p2567_p8 = pmov %p2566_p11 }
  0x88   : > { %2012 = vsyncadd (%p2567_p8), [#allocation6], 4294966144  ;;  %p2568_p13 = pmov %p2567_p8 }
  0x89   : > { %p2569_p6 = pmov %p2567_p8 }
  0x8a   : > { %2014 = dma.done.wait (%p2568_p13), [#allocation9], 512  }
  0x8b   : > { %2016 = vsyncadd (%p2569_p6), [#allocation9], 4294966784  ;;  %v2049_v0 = vmov 0.0   ;;  %v437_v1 = vld [vmem:[#allocation5 + $0x8] sm:$0xff]  ;;  %v439_v2 = vld [vmem:[#allocation5 + $0x18] sm:$0xff]  ;;  %s2050_s25 = smov 96   ;;  %v446_v16 = vlaneseq }
  0x8c   : > { %524 = vmatprep.mubr.f32.mxu0 %v2049_v0  ;;  %1601 = vmatprep.subr.mxu1 %v2049_v0  ;;  %v436_v3 = vld [vmem:[#allocation5] sm:$0xff]  ;;  %v1652_v4 = vpack.c.bf16 %v439_v2, %v437_v1  ;;  %v438_v5 = vld [vmem:[#allocation5 + $0x10] sm:$0xff]  ;;  %v441_v6 = vld [vmem:[#allocation5 + $0x28] sm:$0xff]  ;;  %s2051_s26 = smov 32   ;;  %vm456_vm0 = vcmask 261120   ;;  %vm2052_vm1 = vmmov 0  }
  0x8d   : > { %v443_v7 = vld [vmem:[#allocation5 + $0x38] sm:$0xff]  ;;  %v1654_v8 = vpack.c.bf16 %v438_v5, %v436_v3  ;;  %v440_v10 = vld [vmem:[#allocation5 + $0x20] sm:$0xff]  ;;  %v442_v11 = vld [vmem:[#allocation5 + $0x30] sm:$0xff]  ;;  %v447_v17 = vshrl.u32 %v446_v16, 7  ;;  %1603 = vmatprep.mubr.msk.f32.mxu1 %vm2052_vm1, %v2049_v0  ;;  %vm559_vm2 = vcmask 64512   ;;  %s427_s12 = scalar_lea.vmem [#allocation11], %s2320_s13 }
  0x8e   : > { %v1656_v9 = vpack.c.bf16 %v443_v7, %v441_v6  ;;  %1653 = vmatprep.subr.bf16.mxu0 %v1652_v4  ;;  %v532_v12 = vld [vmem:[#allocation7] sm:$0xff]  ;;  %v531_v13 = vld [vmem:[%s2537_s3] sm:$0xff]  ;;  %v1658_v14 = vpack.c.bf16 %v442_v11, %v440_v10  ;;  %s2053_s27 = smov 88   ;;  %s2054_s8 = smov 120   ;;  %vm1239_vm3 = vcmask 130048   ;;  %vm1241_vm4 = vcmask 195584  }
  0x8f   : > { %1655 = vmatpush1.bf16.msra.mxu0 %v1654_v8  ;;  %535 = vrot.lane.b32.xlu1 %v532_v12, %s2050_s25  ;;  %v435_v15 = vld [vmem:[%s376_s28] sm:$0xff]  ;;  %v452_v18 = vsub.s32 1, %v447_v17  ;;  %v448_v20 = vsub.s32 0, %v447_v17  ;;  %s2055_s11 = smov 112   ;;  %s2056_s28 = smov 104  }
  0x90   : > { %1657 = vmatprep.subr.bf16.mxu0 %v1656_v9  ;;  %545 = vrot.lane.b32.xlu0 %v531_v13, %s2051_s26  ;;  %v444_v19 = vld [vmem:[%s2536_s2] sm:$0x3]  ;;  %s2057_s19 = smov 64   ;;  %s2058_s21 = smov 80  }
  0x91   : > { %v453_v21 = vrot.slane %v444_v19, %v452_v18  ;;  %v449_v22 = vrot.slane %v444_v19, %v448_v20  ;;  %v2371_v39 = vld [vmem:[%s2539_s5] sm:$0xff]  ;;  %s2060_s18 = smov 56   ;;  %s2061_s29 = smov 40  }
  0x92   : > { %s2062_s24 = smov 48   ;;  %s2064_s22 = smov 8  }
  0x93   : > { %1659 = vmatpush1.bf16.msra.mxu0 %v1658_v14 }
  0x94   : > { %1621 = vmatprep.subr.mxu0 %v2049_v0 }
  0x96   : > { %1557 = vmatmul.mubr.msk.f32.vlgmr.msra.gmra.mrb[0].mxu0 %vm456_vm0, %v435_v15 }
  0x97   : > { %1623 = vmatprep.mubr.msk.f32.mxu0 %vm2052_vm1, %v2049_v0 }
 0x101   : > { %v536_v28 = vpop.permute.xlu1 %535 }
 0x102   : > { %v546_v30 = vpop.permute.xlu0 %545 }
 0x169   : > { %v526_v23 = vpop.f32.mrb[0].mxu0 }
 0x16a   : > { %v528_v24 = vpop.f32.mrb[1].mxu0  ;;  %v2349_v26 = vadd.f32 %v526_v23, %v449_v22 }
 0x16b   : > { %v529_v25 = vadd.f32 %v528_v24, %v453_v21 }
 0x16c   : > { %v538_v29 = vmul.f32 %v536_v28, %v2349_v26  ;;  %v548_v31 = vmul.f32 %v546_v30, %v2349_v26  ;;  %v533_v35 = vmul.f32 %v531_v13, %v2349_v26 }
 0x16d   : > { %v549_v27 = vmul.f32 %v532_v12, %v529_v25 }
 0x16f   : > { %551 = vrot.lane.b32.xlu0 %v549_v27, %s2051_s26 }
 0x173   : > { %540 = vrot.lane.b32.xlu0 %v538_v29, %s2051_s26  ;;  %s434_s26 = scalar_lea.vmem [#allocation13], %s2320_s13 }
 0x1e1   : > { %v552_v32 = vpop.permute.xlu0 %551 }
 0x1e2   : > { %v554_v33 = vadd.f32 %v552_v32, %v548_v31 }
 0x1e4   : > { %557 = vrot.lane.b32.xlu1 %v554_v33, %s2050_s25  ;;  %s2059_s25 = smov 72  }
 0x1e5   : > { %v541_v34 = vpop.permute.xlu0 %540 }
 0x1e6   : > { %v543_v37 = vadd.f32 %v541_v34, %v533_v35 }
 0x256   : > { %v558_v36 = vpop.permute.xlu1 %557 }
 0x257   : > { %1329 = vst.msk [vmem:[%s427_s12] sm:$0xff] %vm456_vm0, %v558_v36  ;;  %1602 = vmatpush3.xpose.msk.msra.mxu1 %vm559_vm2, %v558_v36 }
 0x258   : > { %1606 = vmatprep.subr.mxu1 %v2049_v0 }
 0x25a   : > { %1604 = vmatmul.mubr.msk.f32.vlgmr.msra.gmra.mrb[0].mxu1 %vm559_vm2, %v543_v37 }
 0x25b   : > { %1608 = vmatprep.mubr.msk.f32.mxu1 %vm2052_vm1, %v2049_v0 }
 0x32d   : > { %v631_v38 = vpop.f32.mrb[0].mxu1 }
 0x32e   : > { %v635_v40 = vmul.f32 0.35355338, %v631_v38  ;;  %v1605_v41 = vpop.f32.mrb[1].mxu1 }
 0x32f   : > { %v1244_v41 = vld [vmem:[#allocation8 + $0x8] sm:$0xff] }
 0x330   : > { %v636_v42 = vadd.f32 %v635_v40, %v2371_v39  ;;  %v1243_v40 = vld [vmem:[#allocation8] sm:$0xff] }
 0x332   : > { %v637_v43 = vsel %vm559_vm2, %v636_v42, -inf }
 0x333   : > { %638 = vmax.xlane.f32.xlu1 %v637_v43  ;;  %v1661_v43 = vpack.c.bf16 %v1244_v41, %v1243_v40 }
 0x344   : > { %727 = vrot.lane.b32.xlu1 %v554_v33, %s2053_s27  ;;  %s2065_s27 = smov 16  }
 0x348   : > { %725 = vrot.lane.b32.xlu1 %v543_v37, %s2054_s8  ;;  %s2066_s8 = smov 24  }
 0x34c   : > { %892 = vrot.lane.b32.xlu1 %v543_v37, %s2055_s11  ;;  %s1336_s11 = sand.u32 1, %s2146_s17  }
 0x350   : > { %1059 = vrot.lane.b32.xlu1 %v543_v37, %s2056_s28  ;;  %s2427_s28 = sshll.u32 %s2146_s17, 7  ;;  %s2067_s17 = smov [#allocation11]  }
 0x3c0   : > { %v639_v44 = vpop.xlane.xlu1 %638 }
 0x3c1   : > { %v640_v45 = vsub.f32 %v636_v42, %v639_v44  ;;  %v2063_v42 = vmov 0.0|0.0   ;;  %v1245_v44 = vld [vmem:[#allocation8 + $0x10] sm:$0xff] }
 0x3c3   : > { %v641_v46 = vmul.f32 1.442695, %v640_v45  ;;  %v1246_v45 = vld [vmem:[#allocation8 + $0x18] sm:$0xff] }
 0x3c4   : > { %v728_v49 = vpop.permute.xlu1 %727 }
 0x3c5   : > { %1775 = vpow2.f32 %v641_v46  ;;  %v1664_v46 = vpack.c.bf16 %v1246_v45, %v1245_v44 }
 0x3c8   : > { %v726_v51 = vpop.permute.xlu1 %725 }
 0x3cc   : > { %v893_v54 = vpop.permute.xlu1 %892 }
 0x3cf   : > { %v1776_v47 = vpop.eup %1775 }
 0x3d0   : > { %v643_v48 = vsel %vm559_vm2, %v1776_v47, 0.0  ;;  %v1060_v58 = vpop.permute.xlu1 %1059 }
 0x3d1   : > { %644 = vadd.xlane.f32.xlu0 %v643_v48 }
 0x3e7   : > { %649 = vrot.lane.b32.xlu0 %v2349_v26, %s2057_s19 }
 0x3eb   : > { %894 = vrot.lane.b32.xlu0 %v554_v33, %s2058_s21 }
 0x3ef   : > { %1061 = vrot.lane.b32.xlu0 %v554_v33, %s2059_s25  ;;  %s2433_s25 = scalar_lea.hbm %s2543_s9, %s2427_s28 }
 0x45e   : > { %v645_v50 = vpop.xlane.xlu0 %644 }
 0x45f   : > { %1777 = vrcp.f32 %v645_v50 }
 0x462   : > { %v650_v52 = vpop.permute.xlu0 %649 }
 0x463   : > { %1330 = vst.msk [vmem:[%s434_s26] sm:$0xff] %vm456_vm0, %v650_v52  ;;  %1607 = vmatpush3.msra.mxu1 %v650_v52 }
 0x464   : > { %1611 = vmatprep.subr.mxu1 %v2049_v0 }
 0x466   : > { %v895_v53 = vpop.permute.xlu0 %894 }
 0x467   : > { %1622 = vmatpush3.xpose.msk.msra.mxu0 %vm559_vm2, %v895_v53 }
 0x468   : > { %1631 = vmatprep.subr.mxu0 %v2049_v0 }
 0x469   : > { %v1778_v55 = vpop.eup %1777 }
 0x46a   : > { %v647_v56 = vmul.f32 %v1778_v55, %v1776_v47  ;;  %v1062_v57 = vpop.permute.xlu0 %1061  ;;  %1624 = vmatmul.mubr.msk.f32.vlgmr.msra.gmra.mrb[2].mxu0 %vm559_vm2, %v893_v54 }
 0x46b   : > { %1632 = vmatpush3.xpose.msk.msra.mxu0 %vm559_vm2, %v1062_v57  ;;  %1633 = vmatprep.mubr.msk.f32.mxu0 %vm2052_vm1, %v2049_v0 }
 0x46c   : > { %1609 = vmatmul.mubr.msk.f32.vlgmr.msra.gmra.mrb[2].mxu1 %vm559_vm2, %v647_v56  ;;  %1660 = vmatprep.subr.bf16.mxu0 %v2063_v42 }
 0x46d   : > { %1612 = vmatpush3.xpose.msk.msra.mxu1 %vm559_vm2, %v728_v49  ;;  %1613 = vmatprep.mubr.msk.f32.mxu1 %vm2052_vm1, %v2049_v0 }
 0x46e   : > { %1634 = vmatmul.mubr.msk.f32.vlgmr.msra.gmra.mrb[4].mxu0 %vm559_vm2, %v1060_v58  ;;  %1616 = vmatprep.subr.mxu1 %v2049_v0 }
 0x46f   : > { %1649 = vmatprep.mubr.msk.f32.mxu0 %vm2052_vm1, %v2049_v0  ;;  %1662 = vmatpush3.bf16.msra.mxu0 %v1661_v43 }
 0x470   : > { %1614 = vmatmul.mubr.msk.f32.vlgmr.msra.gmra.mrb[4].mxu1 %vm559_vm2, %v726_v51  ;;  %1663 = vmatprep.subr.bf16.mxu0 %v2063_v42 }
 0x471   : > { %1618 = vmatprep.mubr.msk.f32.mxu1 %vm2052_vm1, %v2049_v0 }
 0x473   : > { %1665 = vmatpush3.bf16.msra.mxu0 %v1664_v46 }
 0x53d   : > { %v966_v59 = vpop.f32.mrb[2].mxu0 }
 0x53e   : > { %v970_v60 = vmul.f32 0.35355338, %v966_v59  ;;  %v1625_v61 = vpop.f32.mrb[3].mxu0 }
 0x53f   : > { %v2399_v62 = vpop.f32.mrb[2].mxu1 }
 0x540   : > { %v1610_v63 = vpop.f32.mrb[3].mxu1  ;;  %v971_v1 = vadd.f32 %v970_v60, %v2371_v39 }
 0x541   : > { %v1133_v2 = vpop.f32.mrb[4].mxu0 }
 0x542   : > { %v1635_v3 = vpop.f32.mrb[5].mxu0  ;;  %v972_v4 = vsel %vm559_vm2, %v971_v1, -inf  ;;  %v1137_v6 = vmul.f32 0.35355338, %v1133_v2 }
 0x543   : > { %973 = vmax.xlane.f32.xlu1 %v972_v4  ;;  %v799_v5 = vpop.f32.mrb[4].mxu1 }
 0x544   : > { %v803_v7 = vmul.f32 0.35355338, %v799_v5  ;;  %v1615_v8 = vpop.f32.mrb[5].mxu1  ;;  %v1138_v11 = vadd.f32 %v1137_v6, %v2371_v39 }
 0x546   : > { %v804_v9 = vadd.f32 %v803_v7, %v2371_v39  ;;  %v1139_v12 = vsel %vm559_vm2, %v1138_v11, -inf }
 0x548   : > { %v805_v10 = vsel %vm559_vm2, %v804_v9, -inf }
 0x549   : > { %806 = vmax.xlane.f32.xlu0 %v805_v10 }
 0x54d   : > { %1140 = vmax.xlane.f32.xlu0 %v1139_v12 }
 0x5d0   : > { %v974_v13 = vpop.xlane.xlu1 %973 }
 0x5d1   : > { %v975_v14 = vsub.f32 %v971_v1, %v974_v13 }
 0x5d3   : > { %v976_v15 = vmul.f32 1.442695, %v975_v14 }
 0x5d5   : > { %1779 = vpow2.f32 %v976_v15 }
 0x5d6   : > { %v807_v16 = vpop.xlane.xlu0 %806 }
 0x5d7   : > { %v808_v17 = vsub.f32 %v804_v9, %v807_v16 }
 0x5d9   : > { %v809_v20 = vmul.f32 1.442695, %v808_v17 }
 0x5da   : > { %v1141_v18 = vpop.xlane.xlu0 %1140 }
 0x5db   : > { %v1142_v19 = vsub.f32 %v1138_v11, %v1141_v18 }
 0x5dd   : > { %v1143_v21 = vmul.f32 1.442695, %v1142_v19 }
 0x5df   : > { %v1780_v22 = vpop.eup %1779  ;;  %1781 = vpow2.f32 %v1143_v21 }
 0x5e0   : > { %v978_v23 = vsel %vm559_vm2, %v1780_v22, 0.0  ;;  %1783 = vpow2.f32 %v809_v20 }
 0x5e1   : > { %979 = vadd.xlane.f32.xlu1 %v978_v23 }
 0x5e9   : > { %v1782_v24 = vpop.eup %1781 }
 0x5ea   : > { %v1145_v25 = vsel %vm559_vm2, %v1782_v24, 0.0  ;;  %v1784_v27 = vpop.eup %1783 }
 0x5eb   : > { %1146 = vadd.xlane.f32.xlu0 %v1145_v25  ;;  %v811_v28 = vsel %vm559_vm2, %v1784_v27, 0.0 }
 0x5ef   : > { %812 = vadd.xlane.f32.xlu0 %v811_v28 }
 0x5f2   : > { %816 = vrot.lane.b32.xlu1 %v2349_v26, %s2060_s18  ;;  %s1368_s18 = sshll.u32 %s427_s12, 4  ;;  %s1369_s18 = int_to_ptr.vmem [resolvable:$true] %s1368_s18 }
 0x5f6   : > { %1150 = vrot.lane.b32.xlu1 %v2349_v26, %s2061_s29  ;;  %s2439_s29 = sshll.u32 %s434_s26, 4  ;;  %s1382_s29 = int_to_ptr.vmem [resolvable:$true] %s2439_s29 }
 0x605   : > { %983 = vrot.lane.b32.xlu0 %v2349_v26, %s2062_s24  ;;  %s2441_s24 = scalar_lea.sflag [#allocation12], %s1336_s11 }
 0x66e   : > { %v980_v29 = vpop.xlane.xlu1 %979 }
 0x672   : > { %v817_v30 = vpop.permute.xlu1 %816 }
 0x673   : > { %1617 = vmatpush3.msra.mxu1 %v817_v30 }
 0x674   : > { %1626 = vmatprep.subr.mxu1 %v2049_v0 }
 0x676   : > { %v1151_v38 = vpop.permute.xlu1 %1150 }
 0x678   : > { %v1147_v31 = vpop.xlane.xlu0 %1146 }
 0x67c   : > { %v813_v32 = vpop.xlane.xlu0 %812 }
 0x67d   : > { %1785 = vrcp.f32 %v813_v32 }
 0x67e   : > { %1787 = vrcp.f32 %v980_v29 }
 0x67f   : > { %1789 = vrcp.f32 %v1147_v31 }
 0x680   : > { %v984_v36 = vpop.permute.xlu0 %983 }
 0x687   : > { %v1786_v33 = vpop.eup %1785 }
 0x688   : > { %v815_v34 = vmul.f32 %v1786_v33, %v1784_v27  ;;  %v1788_v35 = vpop.eup %1787 }
 0x689   : > { %v982_v26 = vmul.f32 %v1788_v35, %v1780_v22  ;;  %v1790_v37 = vpop.eup %1789 }
 0x68a   : > { %1619 = vmatmul.mubr.msk.f32.vlgmr.msra.gmra.mrb[6].mxu1 %vm559_vm2, %v815_v34  ;;  %v1149_v39 = vmul.f32 %v1790_v37, %v1782_v24 }
 0x68b   : > { %1627 = vmatpush3.msra.mxu1 %v984_v36  ;;  %1628 = vmatprep.mubr.msk.f32.mxu1 %vm2052_vm1, %v2049_v0 }
 0x68c   : > { %1636 = vmatprep.subr.mxu1 %v2049_v0 }
 0x68e   : > { %1629 = vmatmul.mubr.msk.f32.vlgmr.msra.gmra.mrb[8].mxu1 %vm559_vm2, %v982_v26 }
 0x68f   : > { %1637 = vmatpush3.msra.mxu1 %v1151_v38  ;;  %1638 = vmatprep.mubr.msk.f32.mxu1 %vm2052_vm1, %v2049_v0 }
 0x692   : > { %1639 = vmatmul.mubr.msk.f32.vlgmr.msra.gmra.mrb[10].mxu1 %vm559_vm2, %v1149_v39 }
 0x75d   : > { %v888_v47 = vpop.f32.mrb[6].mxu1 }
 0x75e   : > { %1227 = vrot.lane.b32.xlu1 %v888_v47, %s2064_s22  ;;  %v1620_v48 = vpop.f32.mrb[7].mxu1  ;;  %s1905_s22 = scalar_lea.vmem %s1369_s18, 128 }
 0x75f   : > { %p1906_p10 = scmp.ne.s32.totalorder %s1369_s18, %s1905_s22 }
 0x761   : > { %v1055_v49 = vpop.f32.mrb[8].mxu1  ;;  %p1907_p3 = pnand %p1906_p10, %p2272_p5 }
 0x762   : > { %1231 = vrot.lane.b32.xlu0 %v1055_v49, %s2065_s27  ;;  %v1630_v0 = vpop.f32.mrb[9].mxu1  ;;  %s1909_s27 = sshll.u32 %s2067_s17, 4  ;;  %s1910_s27 = int_to_ptr.vmem [resolvable:$false] %s1909_s27 }
 0x763   : > { %p1908_p7 = pneg %p1907_p3  ;;  %p1912_p12 = scmp.lt.s32.totalorder %s1369_s18, %s1910_s27 }
 0x765   : > { %v1222_v50 = vpop.f32.mrb[10].mxu1 }
 0x766   : > { %1235 = vrot.lane.b32.xlu1 %v1222_v50, %s2066_s8  ;;  %v1640_v51 = vpop.f32.mrb[11].mxu1  ;;  %s1911_s8 = scalar_lea.vmem %s1910_s27, 256 }
 0x767   : > { %p1913_p2 = scmp.lt.s32.totalorder %s1911_s8, %s1905_s22 }
 0x769   : > { %p1914_p1 = por %p1913_p2, %p1912_p12 }
 0x76b   : > { %p1915_p4 = pnand %p1914_p1, %p1908_p7 }
 0x7d0   : > { %v1228_v52 = vpop.permute.xlu1 %1227 }
 0x7d1   : > { %v1238_v54 = vsel %vm559_vm2, %v2399_v62, %v1228_v52 }
 0x7d4   : > { %v1232_v53 = vpop.permute.xlu0 %1231 }
 0x7d5   : > { %v1240_v55 = vsel %vm1239_vm3, %v1238_v54, %v1232_v53 }
 0x7d8   : > { %v1236_v56 = vpop.permute.xlu1 %1235 }
 0x7d9   : > { %v1242_v57 = vsel %vm1241_vm4, %v1240_v55, %v1236_v56 }
 0x7da   : > { %1650 = vmatmul.mubr.msk.f32.vlgmr.msra.gmra.mrb[6].mxu0 %vm456_vm0, %v1242_v57 }
 0x7db   : > { %1918 = shalt.err (!%p1915_p4)
}
 0x7dc   : > { %s1919_s12 = scalar_lea.hbm %s2433_s25, 128  ;;  %s1923_s19 = scalar_lea.hbm %s2543_s9, 256 }
 0x7dd   : > { %p1920_p0 = scmp.ne.s32.totalorder %s2433_s25, %s1919_s12  ;;  %p1924_p8 = scmp.lt.u32.totalorder %s2433_s25, %s2543_s9 }
 0x7de   : > { %p1925_p13 = scmp.lt.u32.totalorder %s1923_s19, %s1919_s12  ;;  %p1927_p10 = scmp.lt.u32.totalorder %s1919_s12, %s2433_s25 }
 0x7df   : > { %p1921_p9 = pnand %p1920_p0, %p2272_p5 }
 0x7e0   : > { %p1926_p6 = por %p1925_p13, %p1924_p8 }
 0x7e1   : > { %p1922_p11 = pneg %p1921_p9 }
 0x7e2   : > { %p1928_p3 = por %p1927_p10, %p1926_p6 }
 0x7e4   : > { %p1929_p7 = pnand %p1928_p3, %p1922_p11 }
 0x7e6   : > { %1932 = shalt.err (!%p1929_p7)
}
 0x7e7   : > { %1681 = dma.vmem_to_hbm [thread:$0]  (%p2272_p5), %s1369_s18, 128, %s2433_s25, %s2441_s24  }
 0x7e8   : > { %s1379_s8 = scalar_lea.hbm %s2544_s10, %s2427_s28  ;;  %s1933_s26 = scalar_lea.vmem %s1382_s29, 128 }
 0x7e9   : > { %p1934_p12 = scmp.ne.s32.totalorder %s1382_s29, %s1933_s26  ;;  %s2068_s12 = smov [#allocation13]  }
 0x7ea   : > { %s1937_s11 = sshll.u32 %s2068_s12, 4  ;;  %s1938_s11 = int_to_ptr.vmem [resolvable:$false] %s1937_s11 }
 0x7eb   : > { %p1935_p2 = pnand %p1934_p12, %p2272_p5  ;;  %s1939_s19 = scalar_lea.vmem %s1938_s11, 256 }
 0x7ec   : > { %p1940_p4 = scmp.lt.s32.totalorder %s1382_s29, %s1938_s11  ;;  %p1941_p0 = scmp.lt.s32.totalorder %s1939_s19, %s1933_s26 }
 0x7ed   : > { %p1936_p1 = pneg %p1935_p2 }
 0x7ee   : > { %p1942_p9 = por %p1941_p0, %p1940_p4 }
 0x7f0   : > { %p1943_p11 = pnand %p1942_p9, %p1936_p1 }
 0x7f2   : > { %1946 = shalt.err (!%p1943_p11)
}
 0x7f3   : > { %s1947_s25 = scalar_lea.hbm %s1379_s8, 128  ;;  %s1951_s17 = scalar_lea.hbm %s2544_s10, 256 }
 0x7f4   : > { %p1948_p8 = scmp.ne.s32.totalorder %s1379_s8, %s1947_s25  ;;  %p1952_p10 = scmp.lt.u32.totalorder %s1379_s8, %s2544_s10 }
 0x7f5   : > { %p1953_p3 = scmp.lt.u32.totalorder %s1951_s17, %s1947_s25  ;;  %p1955_p12 = scmp.lt.u32.totalorder %s1947_s25, %s1379_s8 }
 0x7f6   : > { %p1949_p13 = pnand %p1948_p8, %p2272_p5 }
 0x7f7   : > { %p1954_p7 = por %p1953_p3, %p1952_p10 }
 0x7f8   : > { %p1950_p6 = pneg %p1949_p13 }
 0x7f9   : > { %p1956_p2 = por %p1955_p12, %p1954_p7 }
 0x7fb   : > { %p1957_p1 = pnand %p1956_p2, %p1950_p6 }
 0x7fd   : > { %1960 = shalt.err (!%p1957_p1)
}
 0x7fe   : > { %1682 = dma.vmem_to_hbm [thread:$0]  (%p2272_p5), %s1382_s29, 128, %s1379_s8, %s2441_s24  }
 0x7ff   : > { %s2570_s11 = sld [smem:[#allocation21_spill]]  ;;  %s420_s19 = scalar_lea.vmem [#allocation10], %s2320_s13 }
 0x800   : > { %s1355_s18 = sshll.u32 %s420_s19, 4  ;;  %s2571_s17 = sld [smem:[#allocation22_spill]]  ;;  %s2489_s18 = int_to_ptr.vmem [resolvable:$true] %s1355_s18 }
 0x801   : > { %s1332_s29 = scalar_lea.sflag [#allocation4], %s2317_s23  ;;  %s1961_s24 = scalar_lea.vmem %s2489_s18, 128 }
 0x802   : > { %p1962_p4 = scmp.ne.s32.totalorder %s2489_s18, %s1961_s24  ;;  %s2069_s13 = smov [#allocation10]  }
 0x803   : > { %s1965_s8 = sshll.u32 %s2069_s13, 4  ;;  %s1966_s8 = int_to_ptr.vmem [resolvable:$false] %s1965_s8 }
 0x804   : > { %p1963_p0 = pnand %p1962_p4, %p2272_p5  ;;  %s1967_s27 = scalar_lea.vmem %s1966_s8, 256 }
 0x805   : > { %v1570_v58 = vld [vmem:[%s2570_s11] ss:$0 sm:$0xff]  ;;  %p1968_p11 = scmp.lt.s32.totalorder %s2489_s18, %s1966_s8  ;;  %p1969_p8 = scmp.lt.s32.totalorder %s1967_s27, %s1961_s24 }
 0x806   : > { %s2487_s22 = scalar_lea.hbm %s2571_s17, %s2427_s28  ;;  %p1964_p9 = pneg %p1963_p0 }
 0x807   : > { %p1970_p13 = por %p1969_p8, %p1968_p11 }
 0x809   : > { %p1971_p6 = pnand %p1970_p13, %p1964_p9 }
 0x8ad   : > { %v1323_v59 = vpop.f32.mrb[6].mxu0 }
 0x8ae   : > { %v1324_v60 = vadd.f32 %v1570_v58, %v1323_v59  ;;  %v1651_v61 = vpop.f32.mrb[7].mxu0 }
 0x8b0   : > { %1327 = vst.msk [vmem:[%s420_s19] sm:$0xff] %vm456_vm0, %v1324_v60 }
 0x8b1   : > { %1974 = shalt.err (!%p1971_p6)
}
 0x8b2   : > { %s1975_s23 = scalar_lea.hbm %s2487_s22, 128  ;;  %s1979_s12 = scalar_lea.hbm %s2571_s17, 256 }
 0x8b3   : > { %p1976_p10 = scmp.ne.s32.totalorder %s2487_s22, %s1975_s23  ;;  %p1980_p12 = scmp.lt.u32.totalorder %s2487_s22, %s2571_s17 }
 0x8b4   : > { %p1981_p2 = scmp.lt.u32.totalorder %s1979_s12, %s1975_s23  ;;  %p1983_p4 = scmp.lt.u32.totalorder %s1975_s23, %s2487_s22 }
 0x8b5   : > { %p1977_p3 = pnand %p1976_p10, %p2272_p5 }
 0x8b6   : > { %p1982_p1 = por %p1981_p2, %p1980_p12 }
 0x8b7   : > { %p1978_p7 = pneg %p1977_p3 }
 0x8b8   : > { %p1984_p0 = por %p1983_p4, %p1982_p1 }
 0x8ba   : > { %p1985_p9 = pnand %p1984_p0, %p1978_p7 }
 0x8bc   : > { %1988 = shalt.err (!%p1985_p9)
}
 0x8bd   : > { %1680 = dma.vmem_to_hbm [thread:$0]  (%p2272_p5), %s2489_s18, 128, %s2487_s22, %s1332_s29  }
 0x8be PF: > { %s2572_s25 = sld [smem:[#allocation19_spill]]  ;;  %s2573_s21 = sld [smem:[#allocation20_spill]] }
 0x8bf   : > { %p2575_p8 = scmp.ge.s32.totalorder %s2039_s16, 2 }
 0x8c4   : > { %s1393_s24 = sand.u32 1, %s2572_s25   ;;  %p2574_p11 = scmp.ne.s32.totalorder %s2573_s21, 0 }
 0x8c5   : > { %s1394_s13 = scalar_lea.sflag [#allocation4], %s1393_s24 }
 0x8c6   : > { %p1701_p13 = pnand %p2575_p8, %p2574_p11 }
 0x8c8   : > { %2018 = dma.done.wait (!%p1701_p13), %s1394_s13, 128  }
 0x8c9   : > { %2020 = vsyncadd (!%p1701_p13), %s1394_s13, 4294967168  ;;  %s2576_s8 = sadd.s32 4294967294, %s2039_s16  }
 0x8ca   : > { %s1402_s27 = sand.u32 1, %s2576_s8  }
 0x8cb   : > { %s1403_s23 = scalar_lea.sflag [#allocation12], %s1402_s27 }
 0x8cc   : > { %2022 = dma.done.wait (!%p1701_p13), %s1403_s23, 256  }
 0x8cd   : > { %2024 = vsyncadd (!%p1701_p13), %s1403_s23, 4294967040  ;;  %p29_p5 = scmp.ge.s32.totalorder %s2258_s7, 4   ;;  %s2577_s13 = smov %s2031_s14 }
 0x8ce   : > { %s2578_s14 = smov %s2035_s15  ;;  %s2579_s15 = smov %s2268_s20 }
 0x8cf   : > { %s2580_s16 = smov %s2258_s7  ;;  %31 = sbr.rel (!%p29_p5) target bundleno = 12 (0xc), region = 141 }
 0x8d6   :  { %1417 = vsyncpa [#allocation3], 1 }
 0x8d7   :  { %1419 = vsyncpa [#allocation3 + $0x1], 1 }
 0x8d8   :  { %1420 = vsyncpa [#allocation6], 1 }
 0x8d9   :  { %1421 = vsyncpa [#allocation9], 1 }
 0x8da   :  { %1422 = vsyncpa [#allocation4], 1 }
 0x8db   :  { %1424 = vsyncpa [#allocation4 + $0x1], 1 }
 0x8dc   :  { %1425 = vsyncpa [#allocation12], 1 }
 0x8dd   :  { %1427 = vsyncpa [#allocation12 + $0x1], 1 }

</bundles_post_ra>
